<compile_context>
chip_gen: v7x
topology: tpu7x:2x2x1
jax: 0.10.0
libtpu: 0.0.40
codegen_flags: <defaults>
</compile_context>

<pallas_src>
import functools

import jax
import jax.numpy as jnp
from jax.experimental import pallas as pl
from jax.experimental.pallas import tpu as pltpu


# ----------------------------- helpers ---------------------------------------

def _round_up(x: int, m: int) -> int:
    return (x + m - 1) // m * m


def _block_diag(a, b):
    m, n = a.shape
    p, q = b.shape
    out = jnp.zeros((m + p, n + q), a.dtype)
    out = out.at[:m, :n].set(a)
    out = out.at[m:, n:].set(b)
    return out


# ----------------------------- kernel ---------------------------------------

def _make_kernel(n_layers: int, d: int, inv_action_dim: float):
    """Fused dueling-DQN forward over packed weights.

    Refs: x (TB, D), w_packed (n_layers*D, D), b_packed (Lp, D), out (TB, D).
    Layers 0 .. n_layers-2 are Linear+ReLU; the last layer is the fused dueling
    head whose output has V in column 0, advantages in columns 1..action_dim,
    and exact zeros in all padded columns.
    """
    n_relu = n_layers - 1

    def kernel(x_ref, w_ref, b_ref, o_ref):
        h = x_ref[...]                                   # (TB, D) f32

        # Feature MLP + fused stream hidden layers (all Linear + ReLU).
        for l in range(n_relu):
            w = w_ref[l * d:(l + 1) * d, :]              # static (D, D) view
            b = b_ref[l:l + 1, :]                        # (1, D)
            h = jnp.maximum(
                jnp.dot(h, w, preferred_element_type=jnp.float32) + b, 0.0)

        # Fused dueling head (block-diagonal V / A weights packed in wrapper).
        l = n_layers - 1
        w = w_ref[l * d:(l + 1) * d, :]
        b = b_ref[l:l + 1, :]
        va = jnp.dot(h, w, preferred_element_type=jnp.float32) + b  # (TB, D)

        # Dueling combine: col 0 = V, cols 1..A = advantages, rest exactly 0.
        v = va[:, 0:1]                                   # (TB, 1)
        row_sum = jnp.sum(va, axis=1, keepdims=True)     # V + sum(A) (+ zeros)
        adv_mean = (row_sum - v) * inv_action_dim        # mean over real A only
        # q_j = A_j + V - mean(A) in the advantage columns; other columns are
        # sliced off in the wrapper.  Lane-dense (unmasked) store.
        o_ref[...] = va + (v - adv_mean)

    return kernel


# ----------------------------- param packing ---------------------------------

def pack_dueling_params(params_feat, params_val, params_adv):
    """Fuse the two streams and pack all layers into two lane-aligned buffers.

    params_*: lists of (W, b), W shape (in, out), b shape (out,)  [W is the
    transpose of the PyTorch Linear weight].
    Returns (w_packed (L*D, D), b_packed (Lp, D), D, L).
    """
    nv = len(params_val) - 1
    na = len(params_adv) - 1
    assert nv == na, "fused path requires equal value/advantage stream depths"
    # TODO(synk): unequal-depth value/advantage streams need an unfused fallback.

    fused = list(params_feat)

    # Stream hidden layers: the first shares the feature input -> column
    # concat; deeper ones operate on disjoint halves -> block diagonal.
    for i in range(nv):
        wv, bv = params_val[i]
        wa, ba = params_adv[i]
        w = jnp.concatenate([wv, wa], axis=1) if i == 0 else _block_diag(wv, wa)
        fused.append((w, jnp.concatenate([bv, ba], axis=0)))

    # Final heads: value -> col 0, advantage -> cols 1..action_dim.
    wvf, bvf = params_val[-1]
    waf, baf = params_adv[-1]
    wf = jnp.concatenate([wvf, waf], axis=1) if nv == 0 else _block_diag(wvf, waf)
    fused.append((wf, jnp.concatenate([bvf, baf], axis=0)))

    dims = []
    for w, _ in fused:
        dims += [w.shape[0], w.shape[1]]
    d = _round_up(max(dims), 128)

    n_layers = len(fused)
    w_blocks, b_rows = [], []
    for w, b in fused:
        wp = jnp.zeros((d, d), jnp.float32).at[:w.shape[0], :w.shape[1]].set(w)
        bp = jnp.zeros((d,), jnp.float32).at[:b.shape[0]].set(b)
        w_blocks.append(wp)
        b_rows.append(bp)
    w_packed = jnp.concatenate(w_blocks, axis=0)            # (L*D, D)
    lp = _round_up(max(n_layers, 8), 8)
    b_packed = jnp.zeros((lp, d), jnp.float32).at[:n_layers, :].set(
        jnp.stack(b_rows))                                   # (Lp, D)
    return w_packed, b_packed, d, n_layers


# ----------------------------- wrapper ---------------------------------------

def dueling_dqn_forward(x, w_packed, b_packed, *, action_dim, n_layers, d):
    b_size = x.shape[0]
    tb = min(128, _round_up(b_size, 8))          # batch tile (sublane-aligned)
    b_pad = _round_up(b_size, tb)
    lp = b_packed.shape[0]

    # Lane-dense, sublane-aligned input block (padded cols/rows are zero).
    xp = jnp.zeros((b_pad, d), jnp.float32).at[:b_size, :x.shape[1]].set(x)

    kernel = _make_kernel(n_layers, d, 1.0 / float(action_dim))
    out = pl.pallas_call(
        kernel,
        out_shape=jax.ShapeDtypeStruct((b_pad, d), jnp.float32),
        grid=(b_pad // tb,),
        in_specs=[
            pl.BlockSpec((tb, d), lambda i: (i, 0)),             # activations
            pl.BlockSpec((n_layers * d, d), lambda i: (0, 0)),   # all weights
            pl.BlockSpec((lp, d), lambda i: (0, 0)),             # all biases
        ],
        out_specs=pl.BlockSpec((tb, d), lambda i: (i, 0)),
        compiler_params=pltpu.CompilerParams(
            dimension_semantics=("parallel",)),
    )(xp, w_packed, b_packed)

    # Q-values live in columns 1..action_dim of the lane-dense output.
    return out[:b_size, 1:1 + action_dim]


# ----------------------------- param init ------------------------------------

def init_linear(key, in_dim, out_dim):
    kw, kb = jax.random.split(key)
    w = (jax.random.normal(kw, (in_dim, out_dim), jnp.float32)
         * (1.0 / jnp.sqrt(jnp.float32(in_dim))))
    b = jax.random.normal(kb, (out_dim,), jnp.float32) * 0.01
    return w, b


def build_params(key, state_dim, action_dim, hidden_dims,
                 value_hidden_dims, advantage_hidden_dims):
    feat, val, adv = [], [], []
    in_dim = state_dim
    for h in hidden_dims:
        key, sub = jax.random.split(key)
        feat.append(init_linear(sub, in_dim, h))
        in_dim = h
    feat_out = in_dim
    v_in = feat_out
    for h in value_hidden_dims:
        key, sub = jax.random.split(key)
        val.append(init_linear(sub, v_in, h))
        v_in = h
    key, sub = jax.random.split(key)
    val.append(init_linear(sub, v_in, 1))
    a_in = feat_out
    for h in advantage_hidden_dims:
        key, sub = jax.random.split(key)
        adv.append(init_linear(sub, a_in, h))
        a_in = h
    key, sub = jax.random.split(key)
    adv.append(init_linear(sub, a_in, action_dim))
    return feat, val, adv


# ----------------------------- reference (pure JAX) ---------------------------

def reference_forward(x, params_feat, params_val, params_adv):
    h = x
    for w, b in params_feat:
        h = jnp.maximum(h @ w + b, 0.0)
    v = h
    for i, (w, b) in enumerate(params_val):
        v = v @ w + b
        if i < len(params_val) - 1:
            v = jnp.maximum(v, 0.0)
    a = h
    for i, (w, b) in enumerate(params_adv):
        a = a @ w + b
        if i < len(params_adv) - 1:
            a = jnp.maximum(a, 0.0)
    return v + (a - jnp.mean(a, axis=1, keepdims=True))


# ----------------------------- main -------------------------------------------

if __name__ == "__main__":
    # Small architecture consistent with the module's __init__ arguments.
    state_dim = 32
    action_dim = 8
    hidden_dims = [64, 64]
    value_stream_hidden_dims = [32]
    advantage_stream_hidden_dims = [32]

    key = jax.random.PRNGKey(0)
    key_x, key_p = jax.random.split(key)
    feat, val, adv = build_params(key_p, state_dim, action_dim, hidden_dims,
                                  value_stream_hidden_dims,
                                  advantage_stream_hidden_dims)

    w_packed, b_packed, d, n_layers = pack_dueling_params(feat, val, adv)

    fwd = jax.jit(functools.partial(
        dueling_dqn_forward, action_dim=action_dim, n_layers=n_layers, d=d))

    ok = True
    # Primary small-batch check + a multi-tile check (exercises grid > 1).
    for batch in (8, 160):
        kx, key_x = jax.random.split(key_x)
        x = jax.random.normal(kx, (batch, state_dim), jnp.float32)
        q = jax.block_until_ready(fwd(x, w_packed, b_packed))
        q_ref = reference_forward(x, feat, val, adv)
        ok &= (q.shape == (batch, action_dim))
        ok &= bool(jnp.allclose(q, q_ref, atol=1e-4, rtol=1e-4))

    assert ok, "mismatch vs pure-JAX reference"
    print("KERNEL_OK")
</pallas_src>

<mosaic_0001>
module attributes {stable_mosaic.version = 11 : i64} {
  func.func @kernel(%arg0: i32, %arg1: memref<8x128xf32, #tpu.memory_space<vmem>>, %arg2: memref<512x128xf32, #tpu.memory_space<vmem>>, %arg3: memref<8x128xf32, #tpu.memory_space<vmem>>, %arg4: memref<8x128xf32, #tpu.memory_space<vmem>>) attributes {dimension_semantics = [#tpu.dimension_semantics<parallel>], iteration_bounds = array<i64: 1>, scalar_prefetch = 0 : i64, scratch_operands = 0 : i64, tpu.core_type = #tpu.core_type<tc>, window_params = [{transform_indices = @transform_0, window_bounds = array<i64: 8, 128>}, {pipeline_mode = #tpu.pipeline_mode<synchronous>, transform_indices = @transform_1, window_bounds = array<i64: 512, 128>}, {pipeline_mode = #tpu.pipeline_mode<synchronous>, transform_indices = @transform_2, window_bounds = array<i64: 8, 128>}, {transform_indices = @transform_3, window_bounds = array<i64: 8, 128>}]} {
    %c0 = arith.constant 0 : index
    %c0_0 = arith.constant 0 : index
    %0 = vector.load %arg1[%c0, %c0_0] : memref<8x128xf32, #tpu.memory_space<vmem>>, vector<8x128xf32>
    %c0_1 = arith.constant 0 : index
    %c0_2 = arith.constant 0 : index
    %1 = vector.load %arg2[%c0_1, %c0_2] : memref<512x128xf32, #tpu.memory_space<vmem>>, vector<128x128xf32>
    %c0_3 = arith.constant 0 : index
    %c0_4 = arith.constant 0 : index
    %2 = vector.load %arg3[%c0_3, %c0_4] : memref<8x128xf32, #tpu.memory_space<vmem>>, vector<1x128xf32>
    %cst = arith.constant dense<0.000000e+00> : vector<8x128xf32>
    %3 = tpu.matmul %0, %1, %cst {dimension_numbers = #tpu.dot_dimension_numbers<[1], [0], [0], [1], [0, 0, 1, 1], [], []>} : vector<8x128xf32>, vector<128x128xf32>, vector<8x128xf32> -> vector<8x128xf32>
    %4 = vector.broadcast %2 : vector<1x128xf32> to vector<8x128xf32>
    %5 = arith.addf %3, %4 : vector<8x128xf32>
    %cst_5 = arith.constant 0.000000e+00 : f32
    %6 = vector.broadcast %cst_5 : f32 to vector<8x128xf32>
    %7 = arith.maximumf %5, %6 : vector<8x128xf32>
    %c128 = arith.constant 128 : index
    %c0_6 = arith.constant 0 : index
    %8 = vector.load %arg2[%c128, %c0_6] : memref<512x128xf32, #tpu.memory_space<vmem>>, vector<128x128xf32>
    %c1 = arith.constant 1 : index
    %c0_7 = arith.constant 0 : index
    %9 = vector.load %arg3[%c1, %c0_7] : memref<8x128xf32, #tpu.memory_space<vmem>>, vector<1x128xf32>
    %cst_8 = arith.constant dense<0.000000e+00> : vector<8x128xf32>
    %10 = tpu.matmul %7, %8, %cst_8 {dimension_numbers = #tpu.dot_dimension_numbers<[1], [0], [0], [1], [0, 0, 1, 1], [], []>} : vector<8x128xf32>, vector<128x128xf32>, vector<8x128xf32> -> vector<8x128xf32>
    %11 = vector.broadcast %9 : vector<1x128xf32> to vector<8x128xf32>
    %12 = arith.addf %10, %11 : vector<8x128xf32>
    %cst_9 = arith.constant 0.000000e+00 : f32
    %13 = vector.broadcast %cst_9 : f32 to vector<8x128xf32>
    %14 = arith.maximumf %12, %13 : vector<8x128xf32>
    %c256 = arith.constant 256 : index
    %c0_10 = arith.constant 0 : index
    %15 = vector.load %arg2[%c256, %c0_10] : memref<512x128xf32, #tpu.memory_space<vmem>>, vector<128x128xf32>
    %c2 = arith.constant 2 : index
    %c0_11 = arith.constant 0 : index
    %16 = vector.load %arg3[%c2, %c0_11] : memref<8x128xf32, #tpu.memory_space<vmem>>, vector<1x128xf32>
    %cst_12 = arith.constant dense<0.000000e+00> : vector<8x128xf32>
    %17 = tpu.matmul %14, %15, %cst_12 {dimension_numbers = #tpu.dot_dimension_numbers<[1], [0], [0], [1], [0, 0, 1, 1], [], []>} : vector<8x128xf32>, vector<128x128xf32>, vector<8x128xf32> -> vector<8x128xf32>
    %18 = vector.broadcast %16 : vector<1x128xf32> to vector<8x128xf32>
    %19 = arith.addf %17, %18 : vector<8x128xf32>
    %cst_13 = arith.constant 0.000000e+00 : f32
    %20 = vector.broadcast %cst_13 : f32 to vector<8x128xf32>
    %21 = arith.maximumf %19, %20 : vector<8x128xf32>
    %c384 = arith.constant 384 : index
    %c0_14 = arith.constant 0 : index
    %22 = vector.load %arg2[%c384, %c0_14] : memref<512x128xf32, #tpu.memory_space<vmem>>, vector<128x128xf32>
    %c3 = arith.constant 3 : index
    %c0_15 = arith.constant 0 : index
    %23 = vector.load %arg3[%c3, %c0_15] : memref<8x128xf32, #tpu.memory_space<vmem>>, vector<1x128xf32>
    %cst_16 = arith.constant dense<0.000000e+00> : vector<8x128xf32>
    %24 = tpu.matmul %21, %22, %cst_16 {dimension_numbers = #tpu.dot_dimension_numbers<[1], [0], [0], [1], [0, 0, 1, 1], [], []>} : vector<8x128xf32>, vector<128x128xf32>, vector<8x128xf32> -> vector<8x128xf32>
    %25 = vector.broadcast %23 : vector<1x128xf32> to vector<8x128xf32>
    %26 = arith.addf %24, %25 : vector<8x128xf32>
    %27 = vector.extract_strided_slice %26 {offsets = [0, 0], sizes = [8, 1], strides = [1, 1]} : vector<8x128xf32> to vector<8x1xf32>
    %cst_17 = arith.constant dense<0.000000e+00> : vector<8xf32>
    %28 = vector.multi_reduction <add>, %26, %cst_17 [1] : vector<8x128xf32> to vector<8xf32>
    %29 = vector.shape_cast %28 : vector<8xf32> to vector<8x1xf32>
    %30 = arith.subf %29, %27 : vector<8x1xf32>
    %cst_18 = arith.constant 1.250000e-01 : f32
    %31 = vector.broadcast %cst_18 : f32 to vector<8x1xf32>
    %32 = arith.mulf %30, %31 : vector<8x1xf32>
    %33 = arith.subf %27, %32 : vector<8x1xf32>
    %34 = vector.broadcast %33 : vector<8x1xf32> to vector<8x128xf32>
    %35 = arith.addf %26, %34 : vector<8x128xf32>
    %c0_19 = arith.constant 0 : index
    %c0_20 = arith.constant 0 : index
    %36 = vector.load %arg4[%c0_19, %c0_20] : memref<8x128xf32, #tpu.memory_space<vmem>>, vector<8x128xf32>
    tpu.vector_store %arg4[%c0_19, %c0_20], %35 {strides = array<i32>} : memref<8x128xf32, #tpu.memory_space<vmem>>, vector<8x128xf32>,
    return
  }
  func.func @transform_0(%arg0: i32) -> (i32, i32) {
    %c0_i32 = arith.constant 0 : i32
    %c0_i32_0 = arith.constant 0 : i32
    return %arg0, %c0_i32 : i32, i32
  }
  func.func @transform_1(%arg0: i32) -> (i32, i32) {
    %c0_i32 = arith.constant 0 : i32
    %c0_i32_0 = arith.constant 0 : i32
    %c0_i32_1 = arith.constant 0 : i32
    return %c0_i32, %c0_i32_0 : i32, i32
  }
  func.func @transform_2(%arg0: i32) -> (i32, i32) {
    %c0_i32 = arith.constant 0 : i32
    %c0_i32_0 = arith.constant 0 : i32
    %c0_i32_1 = arith.constant 0 : i32
    return %c0_i32, %c0_i32_0 : i32, i32
  }
  func.func @transform_3(%arg0: i32) -> (i32, i32) {
    %c0_i32 = arith.constant 0 : i32
    %c0_i32_0 = arith.constant 0 : i32
    return %arg0, %c0_i32 : i32, i32
  }
}

</mosaic_0001>

<bundles_post_ra>
// kernel: dueling_dqn_forward.1
= control target key start
LH: loop header
LB: loop body
LE: loop exit
PB: predicated region body
PF: predicated region fallthrough
CT: control target
= control target key end

     0   :  { %8 = vsyncpa [#allocation3], 0  ;;  %s753_s12 = smov [#allocation2]   ;;  %s850_s0 = inlined_call_operand.vmem [shape: f32[8,128], index: 0, kind: input, shape index: {}]   ;;  %s851_s1 = inlined_call_operand.hbm [shape: f32[512,128], index: 1, kind: input, shape index: {}]   ;;  %s852_s2 = inlined_call_operand.vmem [shape: f32[8,128], index: 2, kind: input, shape index: {}]   ;;  %s853_s3 = inlined_call_operand.vmem [shape: f32[8,128], index: 3, kind: output, shape index: {}]  }
   0x1   :  { %s16_s13 = sshll.u32 %s753_s12, 4  ;;  %s729_s16 = scalar_lea.hbm %s851_s1, 8192  ;;  %s17_s13 = int_to_ptr.vmem [resolvable:$true] %s16_s13 }
   0x2   :  { %p730_p0 = scmp.ne.s32.totalorder %s851_s1, %s729_s16  ;;  %p733_p1 = scmp.lt.u32.totalorder %s729_s16, %s851_s1 }
   0x4   :  { %p735_p2 = pnand %p733_p1, %p730_p0 }
   0x6   :  { %738 = shalt.err (!%p735_p2)
}
   0x7   :  { %s739_s21 = scalar_lea.vmem %s17_s13, 8192  ;;  %p744_p4 = scmp.lt.s32.totalorder %s17_s13, %s17_s13 }
   0x8   :  { %p740_p3 = scmp.ne.s32.totalorder %s17_s13, %s739_s21  ;;  %p745_p5 = scmp.lt.s32.totalorder %s739_s21, %s739_s21 }
   0xa   :  { %p746_p6 = por %p745_p5, %p744_p4 }
   0xc   :  { %p747_p7 = pnand %p746_p6, %p740_p3 }
   0xe   :  { %750 = shalt.err (!%p747_p7)
}
   0xf   :  { %s754_s22 = smov 128   ;;  %s755_s23 = smov 8  }
  0x10   :  { %22 = dma.hbm_to_vmem [thread:$0]  %s851_s1, 8192, %s17_s13, [#allocation3], %s754_s22, %s754_s22, %s755_s23  }
  0x11   :  { %751 = dma.done.wait [#allocation3], 8192  }
  0x12   :  { %752 = vsyncadd [#allocation3], 4294959104  ;;  %v756_v0 = vmov 0.0|0.0   ;;  %vm757_vm0 = vmmov 0   ;;  %v758_v1 = vmov 0.0   ;;  %v29_v2 = vld [vmem:[#allocation2] sm:$0xff] }
  0x13   :  { %625 = vmatprep.subr.bf16.mxu0 %v756_v0  ;;  %517 = vmatprep.mubr.msk.f32.mxu0 %vm757_vm0, %v758_v1  ;;  %v30_v3 = vld [vmem:[#allocation2 + $0x8] sm:$0xff]  ;;  %v31_v4 = vld [vmem:[#allocation2 + $0x10] sm:$0xff]  ;;  %v32_v6 = vld [vmem:[#allocation2 + $0x18] sm:$0xff] }
  0x14   :  { %649 = vmatprep.subr.bf16.mxu1 %v756_v0  ;;  %552 = vmatprep.mubr.msk.f32.mxu1 %vm757_vm0, %v758_v1  ;;  %v626_v5 = vpack.c.bf16 %v30_v3, %v29_v2  ;;  %v629_v7 = vpack.c.bf16 %v32_v6, %v31_v4  ;;  %v33_v8 = vld [vmem:[#allocation2 + $0x20] sm:$0xff]  ;;  %v34_v9 = vld [vmem:[#allocation2 + $0x28] sm:$0xff]  ;;  %v123_v12 = vld [vmem:[#allocation2 + $0x90] sm:$0xff] }
  0x15   :  { %v121_v10 = vld [vmem:[#allocation2 + $0x80] sm:$0xff]  ;;  %v122_v11 = vld [vmem:[#allocation2 + $0x88] sm:$0xff]  ;;  %v124_v13 = vld [vmem:[#allocation2 + $0x98] sm:$0xff]  ;;  %v632_v14 = vpack.c.bf16 %v34_v9, %v33_v8 }
  0x16   :  { %627 = vmatpush3.bf16.msra.mxu0 %v626_v5  ;;  %v650_v15 = vpack.c.bf16 %v122_v11, %v121_v10  ;;  %v35_v16 = vld [vmem:[#allocation2 + $0x30] sm:$0xff]  ;;  %v36_v17 = vld [vmem:[#allocation2 + $0x38] sm:$0xff]  ;;  %v653_v18 = vpack.c.bf16 %v124_v13, %v123_v12  ;;  %v125_v19 = vld [vmem:[#allocation2 + $0xa0] sm:$0xff] }
  0x17   :  { %628 = vmatprep.subr.bf16.mxu0 %v756_v0  ;;  %v126_v20 = vld [vmem:[#allocation2 + $0xa8] sm:$0xff]  ;;  %v635_v21 = vpack.c.bf16 %v36_v17, %v35_v16  ;;  %v37_v22 = vld [vmem:[#allocation2 + $0x40] sm:$0xff]  ;;  %v127_v25 = vld [vmem:[#allocation2 + $0xb0] sm:$0xff] }
  0x18   :  { %651 = vmatpush3.bf16.msra.mxu1 %v650_v15  ;;  %v38_v23 = vld [vmem:[#allocation2 + $0x48] sm:$0xff]  ;;  %v656_v24 = vpack.c.bf16 %v126_v20, %v125_v19  ;;  %v128_v26 = vld [vmem:[#allocation2 + $0xb8] sm:$0xff]  ;;  %v39_v28 = vld [vmem:[#allocation2 + $0x50] sm:$0xff] }
  0x19   :  { %652 = vmatprep.subr.bf16.mxu1 %v756_v0  ;;  %v638_v27 = vpack.c.bf16 %v38_v23, %v37_v22  ;;  %v40_v29 = vld [vmem:[#allocation2 + $0x58] sm:$0xff]  ;;  %v659_v30 = vpack.c.bf16 %v128_v26, %v127_v25  ;;  %v129_v31 = vld [vmem:[#allocation2 + $0xc0] sm:$0xff]  ;;  %v130_v32 = vld [vmem:[#allocation2 + $0xc8] sm:$0xff] }
  0x1a   :  { %630 = vmatpush3.bf16.msra.mxu0 %v629_v7  ;;  %v641_v33 = vpack.c.bf16 %v40_v29, %v39_v28  ;;  %v41_v34 = vld [vmem:[#allocation2 + $0x60] sm:$0xff]  ;;  %v42_v35 = vld [vmem:[#allocation2 + $0x68] sm:$0xff]  ;;  %v662_v36 = vpack.c.bf16 %v130_v32, %v129_v31  ;;  %v131_v37 = vld [vmem:[#allocation2 + $0xd0] sm:$0xff] }
  0x1b   :  { %631 = vmatprep.subr.bf16.mxu0 %v756_v0  ;;  %v132_v38 = vld [vmem:[#allocation2 + $0xd8] sm:$0xff]  ;;  %v644_v39 = vpack.c.bf16 %v42_v35, %v41_v34  ;;  %v43_v40 = vld [vmem:[#allocation2 + $0x70] sm:$0xff]  ;;  %v133_v43 = vld [vmem:[#allocation2 + $0xe0] sm:$0xff] }
  0x1c   :  { %654 = vmatpush3.bf16.msra.mxu1 %v653_v18  ;;  %v44_v41 = vld [vmem:[#allocation2 + $0x78] sm:$0xff]  ;;  %v665_v42 = vpack.c.bf16 %v132_v38, %v131_v37  ;;  %v134_v44 = vld [vmem:[#allocation2 + $0xe8] sm:$0xff]  ;;  %v28_v47 = vld [vmem:[%s850_s0] sm:$0xff] }
  0x1d   :  { %655 = vmatprep.subr.bf16.mxu1 %v756_v0  ;;  %v647_v45 = vpack.c.bf16 %v44_v41, %v43_v40  ;;  %v668_v46 = vpack.c.bf16 %v134_v44, %v133_v43  ;;  %v135_v48 = vld [vmem:[#allocation2 + $0xf0] sm:$0xff]  ;;  %v136_v49 = vld [vmem:[#allocation2 + $0xf8] sm:$0xff]  ;;  %v213_v51 = vld [vmem:[#allocation2 + $0x100] sm:$0xff] }
  0x1e   :  { %633 = vmatpush3.bf16.msra.mxu0 %v632_v14  ;;  %v671_v50 = vpack.c.bf16 %v136_v49, %v135_v48  ;;  %v214_v52 = vld [vmem:[#allocation2 + $0x108] sm:$0xff]  ;;  %v215_v53 = vld [vmem:[#allocation2 + $0x110] sm:$0xff]  ;;  %v216_v55 = vld [vmem:[#allocation2 + $0x118] sm:$0xff] }
  0x1f   :  { %634 = vmatprep.subr.bf16.mxu0 %v756_v0  ;;  %v674_v54 = vpack.c.bf16 %v214_v52, %v213_v51  ;;  %v677_v56 = vpack.c.bf16 %v216_v55, %v215_v53  ;;  %v217_v57 = vld [vmem:[#allocation2 + $0x120] sm:$0xff]  ;;  %v218_v58 = vld [vmem:[#allocation2 + $0x128] sm:$0xff]  ;;  %v219_v60 = vld [vmem:[#allocation2 + $0x130] sm:$0xff] }
  0x20   :  { %657 = vmatpush3.bf16.msra.mxu1 %v656_v24  ;;  %v680_v59 = vpack.c.bf16 %v218_v58, %v217_v57  ;;  %v220_v61 = vld [vmem:[#allocation2 + $0x138] sm:$0xff]  ;;  %v221_v63 = vld [vmem:[#allocation2 + $0x140] sm:$0xff]  ;;  %v222_v2 = vld [vmem:[#allocation2 + $0x148] sm:$0xff] }
  0x21   :  { %658 = vmatprep.subr.bf16.mxu1 %v756_v0  ;;  %v683_v62 = vpack.c.bf16 %v220_v61, %v219_v60  ;;  %v686_v3 = vpack.c.bf16 %v222_v2, %v221_v63  ;;  %v223_v4 = vld [vmem:[#allocation2 + $0x150] sm:$0xff]  ;;  %v224_v5 = vld [vmem:[#allocation2 + $0x158] sm:$0xff]  ;;  %v225_v7 = vld [vmem:[#allocation2 + $0x160] sm:$0xff] }
  0x22   :  { %636 = vmatpush3.bf16.msra.mxu0 %v635_v21  ;;  %v689_v6 = vpack.c.bf16 %v224_v5, %v223_v4  ;;  %v226_v8 = vld [vmem:[#allocation2 + $0x168] sm:$0xff]  ;;  %v413_v10 = vld [vmem:[%s852_s2] ss:$0 sm:$0xff]  ;;  %v227_v15 = vld [vmem:[#allocation2 + $0x170] sm:$0xff] }
  0x23   :  { %637 = vmatprep.subr.bf16.mxu0 %v756_v0  ;;  %v692_v9 = vpack.c.bf16 %v226_v8, %v225_v7  ;;  %v228_v16 = vld [vmem:[#allocation2 + $0x178] sm:$0xff]  ;;  %v305_v18 = vld [vmem:[#allocation2 + $0x180] sm:$0xff]  ;;  %v306_v19 = vld [vmem:[#allocation2 + $0x188] sm:$0xff] }
  0x24   :  { %660 = vmatpush3.bf16.msra.mxu1 %v659_v30  ;;  %v695_v17 = vpack.c.bf16 %v228_v16, %v227_v15  ;;  %v307_v20 = vld [vmem:[#allocation2 + $0x190] sm:$0xff]  ;;  %v698_v21 = vpack.c.bf16 %v306_v19, %v305_v18  ;;  %v308_v22 = vld [vmem:[#allocation2 + $0x198] sm:$0xff]  ;;  %v309_v24 = vld [vmem:[#allocation2 + $0x1a0] sm:$0xff] }
  0x25   :  { %661 = vmatprep.subr.bf16.mxu1 %v756_v0  ;;  %v701_v23 = vpack.c.bf16 %v308_v22, %v307_v20  ;;  %v310_v25 = vld [vmem:[#allocation2 + $0x1a8] sm:$0xff]  ;;  %v313_v29 = vld [vmem:[#allocation2 + $0x1c0] sm:$0xff]  ;;  %v315_v32 = vld [vmem:[#allocation2 + $0x1d0] sm:$0xff] }
  0x26   :  { %639 = vmatpush3.bf16.msra.mxu0 %v638_v27  ;;  %v704_v26 = vpack.c.bf16 %v310_v25, %v309_v24  ;;  %v312_v27 = vld [vmem:[#allocation2 + $0x1b8] sm:$0xff]  ;;  %v314_v30 = vld [vmem:[#allocation2 + $0x1c8] sm:$0xff]  ;;  %v317_v35 = vld [vmem:[#allocation2 + $0x1e0] sm:$0xff] }
  0x27   :  { %640 = vmatprep.subr.bf16.mxu0 %v756_v0  ;;  %v710_v31 = vpack.c.bf16 %v314_v30, %v313_v29  ;;  %v414_v38 = vld [vmem:[%s852_s2 + $0x1] ss:$0 sm:$0xff]  ;;  %v319_v43 = vld [vmem:[#allocation2 + $0x1f0] sm:$0xff]  ;;  %v320_v44 = vld [vmem:[#allocation2 + $0x1f8] sm:$0xff] }
  0x28   :  { %663 = vmatpush3.bf16.msra.mxu1 %v662_v36  ;;  %v318_v36 = vld [vmem:[#allocation2 + $0x1e8] sm:$0xff] }
  0x29   :  { %664 = vmatprep.subr.bf16.mxu1 %v756_v0  ;;  %v716_v37 = vpack.c.bf16 %v318_v36, %v317_v35 }
  0x2a   :  { %642 = vmatpush3.bf16.msra.mxu0 %v641_v33  ;;  %v316_v33 = vld [vmem:[#allocation2 + $0x1d8] sm:$0xff] }
  0x2b   :  { %643 = vmatprep.subr.bf16.mxu0 %v756_v0  ;;  %v713_v34 = vpack.c.bf16 %v316_v33, %v315_v32 }
  0x2c   :  { %666 = vmatpush3.bf16.msra.mxu1 %v665_v42 }
  0x2d   :  { %667 = vmatprep.subr.bf16.mxu1 %v756_v0 }
  0x2e   :  { %645 = vmatpush3.bf16.msra.mxu0 %v644_v39 }
  0x2f   :  { %646 = vmatprep.subr.bf16.mxu0 %v756_v0 }
  0x30   :  { %669 = vmatpush3.bf16.msra.mxu1 %v668_v46  ;;  %v415_v46 = vld [vmem:[%s852_s2 + $0x2] ss:$0 sm:$0xff] }
  0x31   :  { %670 = vmatprep.subr.bf16.mxu1 %v756_v0 }
  0x32   :  { %648 = vmatpush3.bf16.msra.mxu0 %v647_v45  ;;  %v719_v45 = vpack.c.bf16 %v320_v44, %v319_v43 }
  0x33   :  { %673 = vmatprep.subr.bf16.mxu0 %v756_v0 }
  0x34   :  { %672 = vmatpush3.bf16.msra.mxu1 %v671_v50  ;;  %v416_v50 = vld [vmem:[%s852_s2 + $0x3] ss:$0 sm:$0xff] }
  0x35   :  { %518 = vmatmul.mubr.f32.vlgmr.msra.gmra.mrb[0].mxu0 %v28_v47  ;;  %697 = vmatprep.subr.bf16.mxu1 %v756_v0 }
  0x36   :  { %587 = vmatprep.mubr.msk.f32.mxu0 %vm757_vm0, %v758_v1  ;;  %675 = vmatpush3.bf16.msra.mxu0 %v674_v54  ;;  %v759_v54 = vmov 0  }
  0x37   :  { %676 = vmatprep.subr.bf16.mxu0 %v756_v0  ;;  %728 = vset.pattern.permute.xlu0 %v759_v54 }
  0x3a   :  { %678 = vmatpush3.bf16.msra.mxu0 %v677_v56 }
  0x3b   :  { %679 = vmatprep.subr.bf16.mxu0 %v756_v0 }
  0x3e   :  { %681 = vmatpush3.bf16.msra.mxu0 %v680_v59 }
  0x3f   :  { %682 = vmatprep.subr.bf16.mxu0 %v756_v0 }
  0x42   :  { %684 = vmatpush3.bf16.msra.mxu0 %v683_v62 }
  0x43   :  { %685 = vmatprep.subr.bf16.mxu0 %v756_v0 }
  0x46   :  { %687 = vmatpush3.bf16.msra.mxu0 %v686_v3 }
  0x47   :  { %688 = vmatprep.subr.bf16.mxu0 %v756_v0 }
  0x4a   :  { %690 = vmatpush3.bf16.msra.mxu0 %v689_v6 }
  0x4b   :  { %691 = vmatprep.subr.bf16.mxu0 %v756_v0 }
  0x4e   :  { %693 = vmatpush3.bf16.msra.mxu0 %v692_v9 }
  0x4f   :  { %694 = vmatprep.subr.bf16.mxu0 %v756_v0 }
  0x52   :  { %696 = vmatpush3.bf16.msra.mxu0 %v695_v17 }
 0x108   :  { %v116_v11 = vpop.f32.mrb[0].mxu0 }
 0x109   :  { %v117_v12 = vadd.f32 %v413_v10, %v116_v11  ;;  %v519_v13 = vpop.f32.mrb[1].mxu0 }
 0x10b   :  { %v120_v14 = vmax.f32 %v117_v12, 0.0 }
 0x10d   :  { %553 = vmatmul.mubr.f32.vlgmr.msra.gmra.mrb[0].mxu1 %v120_v14 }
 0x10e   :  { %622 = vmatprep.mubr.msk.f32.mxu1 %vm757_vm0, %v758_v1  ;;  %699 = vmatpush3.bf16.msra.mxu1 %v698_v21  ;;  %v311_v1 = vld [vmem:[#allocation2 + $0x1b0] sm:$0xff] }
 0x10f   :  { %700 = vmatprep.subr.bf16.mxu1 %v756_v0  ;;  %v707_v28 = vpack.c.bf16 %v312_v27, %v311_v1 }
 0x112   :  { %702 = vmatpush3.bf16.msra.mxu1 %v701_v23 }
 0x113   :  { %703 = vmatprep.subr.bf16.mxu1 %v756_v0 }
 0x116   :  { %705 = vmatpush3.bf16.msra.mxu1 %v704_v26 }
 0x117   :  { %706 = vmatprep.subr.bf16.mxu1 %v756_v0 }
 0x11a   :  { %708 = vmatpush3.bf16.msra.mxu1 %v707_v28 }
 0x11b   :  { %709 = vmatprep.subr.bf16.mxu1 %v756_v0 }
 0x11e   :  { %711 = vmatpush3.bf16.msra.mxu1 %v710_v31 }
 0x11f   :  { %712 = vmatprep.subr.bf16.mxu1 %v756_v0 }
 0x122   :  { %714 = vmatpush3.bf16.msra.mxu1 %v713_v34 }
 0x123   :  { %715 = vmatprep.subr.bf16.mxu1 %v756_v0 }
 0x126   :  { %717 = vmatpush3.bf16.msra.mxu1 %v716_v37 }
 0x127   :  { %718 = vmatprep.subr.bf16.mxu1 %v756_v0 }
 0x12a   :  { %720 = vmatpush3.bf16.msra.mxu1 %v719_v45 }
 0x1e0   :  { %v208_v39 = vpop.f32.mrb[0].mxu1 }
 0x1e1   :  { %v209_v40 = vadd.f32 %v414_v38, %v208_v39  ;;  %v554_v41 = vpop.f32.mrb[1].mxu1 }
 0x1e3   :  { %v212_v42 = vmax.f32 %v209_v40, 0.0 }
 0x1e5   :  { %588 = vmatmul.mubr.f32.vlgmr.msra.gmra.mrb[2].mxu0 %v212_v42 }
 0x2b8   :  { %v300_v47 = vpop.f32.mrb[2].mxu0 }
 0x2b9   :  { %v301_v48 = vadd.f32 %v415_v46, %v300_v47  ;;  %v589_v0 = vpop.f32.mrb[3].mxu0 }
 0x2bb   :  { %v304_v49 = vmax.f32 %v301_v48, 0.0 }
 0x2bd   :  { %623 = vmatmul.mubr.f32.vlgmr.msra.gmra.mrb[2].mxu1 %v304_v49 }
 0x390   :  { %v392_v51 = vpop.f32.mrb[2].mxu1 }
 0x391   :  { %v393_v52 = vadd.f32 %v416_v50, %v392_v51  ;;  %v624_v53 = vpop.f32.mrb[3].mxu1 }
 0x393   :  { %396 = vadd.xlane.f32.xlu0 %v393_v52 }
 0x420   :  { %v397_v55 = vpop.xlane.xlu0 %396 }
 0x421   :  { %v398_v56 = vsub.f32 %v397_v55, %v393_v52 }
 0x423   :  { %v399_v57 = vmul.f32 0.125, %v398_v56 }
 0x425   :  { %v400_v58 = vsub.f32 %v393_v52, %v399_v57 }
 0x427   :  { %403 = vperm.xlu0 %728, %v400_v58  }
 0x4a6   :  { %v404_v59 = vpop.permute.xlu0 %403 }
 0x4a7   :  { %v406_v60 = vadd.f32 %v404_v59, %v393_v52 }
 0x4a9   :  { %407 = vst [vmem:[%s853_s3] sm:$0xff] %v406_v60 }
 0x4aa   :  { %412 = vsyncpa [#allocation3], 1 }

</bundles_post_ra>
